<compile_context>
chip_gen: v6e
topology: v6e:2x2x1
jax: 0.10.0
libtpu: 0.0.40
codegen_flags: <defaults>
</compile_context>

<pallas_src>
import jax
import jax.numpy as jnp
from jax.experimental import pallas as pl
from jax.experimental.pallas import tpu as pltpu


def _round_up(x, m):
    return ((x + m - 1) // m) * m


def _conv1x1_bn_relu_kernel(w_ref, x_ref, b_ref, o_ref):
    # w_ref: (tco, Cin)   compute dtype, BN scale already folded in
    # x_ref: (Cin, thw)   compute dtype (batch dim squeezed out)
    # b_ref: (tco, 1)     float32 folded BN bias
    # o_ref: (tco, thw)   out dtype
    acc = jnp.dot(w_ref[...], x_ref[...], preferred_element_type=jnp.float32)
    o_ref[...] = jnp.maximum(acc + b_ref[...], 0.0).astype(o_ref.dtype)


def _vmem_limit_bytes():
    cap = 64 * 1024 * 1024                     # conservative default = v7x per-TC VMEM
    try:
        info = pltpu.get_tpu_info()
        cap = getattr(info, "vmem_capacity_bytes", cap) or cap
    except Exception:
        pass
    # Leave headroom for compiler scratch / double-buffering bookkeeping.
    return min(int(cap * 0.70), 100 * 1024 * 1024)


def _select_tiles(Cin, Cout, HW, thw_req, tco_req, comp_isz, out_isz, vmem_limit):
    budget = int(vmem_limit * 0.85)
    if thw_req is None:
        thw_req = 4096 if vmem_limit >= 60 * 1024 * 1024 else 1536
    if tco_req is None:
        tco_req = 256

    # Output-channel tile: full dim when it fits (always layout-legal), else a
    # multiple of 16 (bf16 sublane packing; 256 default also matches the MXU).
    if Cout <= tco_req:
        tco = Cout
    else:
        tco = max(16, (tco_req // 16) * 16)

    # Spatial (lane) tile: full dim when it fits, else a multiple of 128.
    if HW <= thw_req:
        thw = HW
    else:
        thw = max(128, (thw_req // 128) * 128)

    def est(thw_, tco_):
        # Double-buffered per-BlockSpec VMEM footprint.
        return 2 * (Cin * thw_ * comp_isz          # x block
                    + tco_ * Cin * comp_isz        # weight block
                    + tco_ * 4                     # bias block (f32)
                    + tco_ * thw_ * out_isz)       # output block

    while est(thw, tco) > budget and thw > 128:
        thw = max(128, _round_up(thw // 2, 128))
    while est(thw, tco) > budget and tco > 16:
        tco = max(16, _round_up(tco // 2, 16))
    return thw, tco


def conv1x1_bn_relu(x_nchw, weight, gamma, beta, running_mean, running_var,
                    eps=1e-5, *, thw=None, tco=None,
                    compute_dtype=jnp.bfloat16, out_dtype=None):
    """x_nchw: (N, Cin, H, W); weight: (Cout, Cin, 1, 1) PyTorch Conv2d layout
    (bias=False); BN params: (Cout,) each (inference mode, folded into w/bias)."""
    N, Cin, H, W = x_nchw.shape
    Cout = weight.shape[0]
    HW = H * W
    if out_dtype is None:
        out_dtype = x_nchw.dtype

    # ---- fold inference BatchNorm into the conv weight + a bias ----
    scale = (gamma / jnp.sqrt(running_var + eps)).astype(jnp.float32)       # (Cout,)
    bias = (beta - running_mean * scale).astype(jnp.float32)                # (Cout,)
    w2d = (weight[:, :, 0, 0].astype(jnp.float32)
           * scale[:, None]).astype(compute_dtype)                          # (Cout, Cin)
    b2d = bias.reshape(Cout, 1)                                             # stays f32

    # x viewed as (N, Cin, H*W): no transpose, no pad.  Ragged last HW / Cout tiles
    # are masked by Pallas; contraction dim Cin is a full (un-tiled) block, so OOB
    # lanes can never contaminate valid outputs.
    x3 = x_nchw.reshape(N, Cin, HW).astype(compute_dtype)

    vmem_limit = _vmem_limit_bytes()
    comp_isz = jnp.dtype(compute_dtype).itemsize
    out_isz = jnp.dtype(out_dtype).itemsize
    thw_eff, tco_eff = _select_tiles(Cin, Cout, HW, thw, tco,
                                     comp_isz, out_isz, vmem_limit)

    # Grid order (N, HW-tiles, Cout-tiles): x block index (n, 0, j) is constant
    # across the innermost c axis -> x DMA'd from HBM exactly once.
    grid = (N, pl.cdiv(HW, thw_eff), pl.cdiv(Cout, tco_eff))

    out = pl.pallas_call(
        _conv1x1_bn_relu_kernel,
        out_shape=jax.ShapeDtypeStruct((N, Cout, HW), out_dtype),
        grid_spec=pltpu.PrefetchScalarGridSpec(
            num_scalar_prefetch=0,
            grid=grid,
            in_specs=[
                # folded weight tile (small; re-fetched only per Cout step)
                pl.BlockSpec((tco_eff, Cin), lambda n, j, c: (c, 0)),
                # activation tile: batch dim squeezed, resident across the c axis
                pl.BlockSpec((None, Cin, thw_eff), lambda n, j, c: (n, 0, j)),
                # folded bias column
                pl.BlockSpec((tco_eff, 1), lambda n, j, c: (c, 0)),
            ],
            out_specs=pl.BlockSpec((None, tco_eff, thw_eff),
                                   lambda n, j, c: (n, c, j)),
        ),
        compiler_params=pltpu.CompilerParams(
            dimension_semantics=("parallel", "parallel", "arbitrary"),
            vmem_limit_bytes=vmem_limit,
            allow_input_fusion=[True, True, True],
        ),
    )(w2d, x3, b2d)

    # (N, Cout, HW) -> NCHW: free metadata reshape, no transpose, no slice.
    return out.reshape(N, Cout, H, W)


def _reference(x_nchw, weight, gamma, beta, running_mean, running_var, eps=1e-5):
    # Pure-JAX f32 reference of the same semantics (1x1 conv, inference BN, ReLU).
    w2d = weight[:, :, 0, 0]  # (Cout, Cin)
    y = jnp.einsum('nchw,oc->nohw', x_nchw, w2d)
    scale = gamma / jnp.sqrt(running_var + eps)
    bias = beta - running_mean * scale
    y = y * scale[None, :, None, None] + bias[None, :, None, None]
    return jnp.maximum(y, 0.0)


if __name__ == "__main__":
    # ---- case 1: module-sized shapes (single tile per axis) ----
    key = jax.random.PRNGKey(0)
    k_x, k_w, k_g, k_b, k_m, k_v = jax.random.split(key, 6)

    N, Cin, Cout, H, W = 2, 4, 8, 16, 16
    x = jax.random.normal(k_x, (N, Cin, H, W), dtype=jnp.float32)
    weight = jax.random.normal(k_w, (Cout, Cin, 1, 1), dtype=jnp.float32) * 0.1
    gamma = jax.random.normal(k_g, (Cout,), dtype=jnp.float32) * 0.1 + 1.0
    beta = jax.random.normal(k_b, (Cout,), dtype=jnp.float32) * 0.1
    running_mean = jax.random.normal(k_m, (Cout,), dtype=jnp.float32) * 0.1
    running_var = jnp.abs(jax.random.normal(k_v, (Cout,), dtype=jnp.float32)) * 0.1 + 1.0

    fn1 = jax.jit(lambda *a: conv1x1_bn_relu(*a))
    out = jax.block_until_ready(fn1(x, weight, gamma, beta, running_mean, running_var))
    ref = _reference(x, weight, gamma, beta, running_mean, running_var)
    assert out.shape == (N, Cout, H, W)
    # bf16 inputs with f32 accumulation -> relaxed tolerance vs f32 reference.
    assert jnp.allclose(out, ref, atol=2e-2, rtol=2e-2), (
        float(jnp.max(jnp.abs(out - ref))))

    # ---- case 2: multi-tile + ragged tiles (Cout > tco, HW > thw, unaligned) ----
    N2, Cin2, Cout2, H2, W2 = 1, 12, 40, 10, 13     # HW=130, neither axis tile-aligned
    k_x2, k_w2, k_g2, k_b2, k_m2, k_v2 = jax.random.split(jax.random.PRNGKey(1), 6)
    x2 = jax.random.normal(k_x2, (N2, Cin2, H2, W2), dtype=jnp.float32)
    w2 = jax.random.normal(k_w2, (Cout2, Cin2, 1, 1), dtype=jnp.float32) * 0.1
    g2 = jax.random.normal(k_g2, (Cout2,), dtype=jnp.float32) * 0.1 + 1.0
    b2 = jax.random.normal(k_b2, (Cout2,), dtype=jnp.float32) * 0.1
    m2 = jax.random.normal(k_m2, (Cout2,), dtype=jnp.float32) * 0.1
    v2 = jnp.abs(jax.random.normal(k_v2, (Cout2,), dtype=jnp.float32)) * 0.1 + 1.0

    fn2 = jax.jit(lambda *a: conv1x1_bn_relu(*a, thw=128, tco=16))
    out2 = jax.block_until_ready(fn2(x2, w2, g2, b2, m2, v2))
    ref2 = _reference(x2, w2, g2, b2, m2, v2)
    assert out2.shape == (N2, Cout2, H2, W2)
    assert jnp.allclose(out2, ref2, atol=3e-2, rtol=3e-2), (
        float(jnp.max(jnp.abs(out2 - ref2))))

    print("KERNEL_OK")
</pallas_src>

<mosaic_0001>
module attributes {stable_mosaic.version = 11 : i64} {
  func.func @_conv1x1_bn_relu_kernel(%arg0: i32, %arg1: i32, %arg2: i32, %arg3: memref<8x4xbf16, #tpu.memory_space<vmem>>, %arg4: memref<1x4x256xbf16, #tpu.memory_space<vmem>>, %arg5: memref<8x1xf32, #tpu.memory_space<vmem>>, %arg6: memref<1x8x256xf32, #tpu.memory_space<vmem>>) attributes {dimension_semantics = [#tpu.dimension_semantics<parallel>, #tpu.dimension_semantics<parallel>, #tpu.dimension_semantics<arbitrary>], iteration_bounds = array<i64: 2, 1, 1>, scalar_prefetch = 0 : i64, scratch_operands = 0 : i64, tpu.core_type = #tpu.core_type<tc>, window_params = [{transform_indices = @transform_0, window_bounds = array<i64: 8, 4>}, {transform_indices = @transform_1, window_bounds = array<i64: 1, 4, 256>}, {transform_indices = @transform_2, window_bounds = array<i64: 8, 1>}, {transform_indices = @transform_3, window_bounds = array<i64: 1, 8, 256>}]} {
    %c0 = arith.constant 0 : index
    %c0_0 = arith.constant 0 : index
    %0 = vector.load %arg3[%c0, %c0_0] : memref<8x4xbf16, #tpu.memory_space<vmem>>, vector<8x4xbf16>
    %c0_1 = arith.constant 0 : index
    %c0_2 = arith.constant 0 : index
    %c0_3 = arith.constant 0 : index
    %1 = vector.load %arg4[%c0_1, %c0_2, %c0_3] : memref<1x4x256xbf16, #tpu.memory_space<vmem>>, vector<1x4x256xbf16>
    %2 = vector.shape_cast %1 : vector<1x4x256xbf16> to vector<4x256xbf16>
    %cst = arith.constant dense<0.000000e+00> : vector<8x256xf32>
    %3 = tpu.matmul %0, %2, %cst {dimension_numbers = #tpu.dot_dimension_numbers<[1], [0], [0], [1], [0, 0, 1, 1], [], []>} : vector<8x4xbf16>, vector<4x256xbf16>, vector<8x256xf32> -> vector<8x256xf32>
    %c0_4 = arith.constant 0 : index
    %c0_5 = arith.constant 0 : index
    %4 = vector.load %arg5[%c0_4, %c0_5] : memref<8x1xf32, #tpu.memory_space<vmem>>, vector<8x1xf32>
    %5 = vector.broadcast %4 : vector<8x1xf32> to vector<8x256xf32>
    %6 = arith.addf %3, %5 : vector<8x256xf32>
    %cst_6 = arith.constant 0.000000e+00 : f32
    %7 = vector.broadcast %cst_6 : f32 to vector<8x256xf32>
    %8 = arith.maximumf %6, %7 : vector<8x256xf32>
    %c0_7 = arith.constant 0 : index
    %c0_8 = arith.constant 0 : index
    %c0_9 = arith.constant 0 : index
    %9 = vector.load %arg6[%c0_7, %c0_8, %c0_9] : memref<1x8x256xf32, #tpu.memory_space<vmem>>, vector<1x8x256xf32>
    %10 = vector.shape_cast %9 : vector<1x8x256xf32> to vector<8x256xf32>
    %11 = vector.shape_cast %8 : vector<8x256xf32> to vector<1x8x256xf32>
    tpu.vector_store %arg6[%c0_7, %c0_8, %c0_9], %11 {strides = array<i32>} : memref<1x8x256xf32, #tpu.memory_space<vmem>>, vector<1x8x256xf32>,
    return
  }
  func.func @transform_0(%arg0: i32, %arg1: i32, %arg2: i32) -> (i32, i32) {
    %c0_i32 = arith.constant 0 : i32
    %c0_i32_0 = arith.constant 0 : i32
    return %arg2, %c0_i32 : i32, i32
  }
  func.func @transform_1(%arg0: i32, %arg1: i32, %arg2: i32) -> (i32, i32, i32) {
    %c0_i32 = arith.constant 0 : i32
    %c0_i32_0 = arith.constant 0 : i32
    return %arg0, %c0_i32, %arg1 : i32, i32, i32
  }
  func.func @transform_2(%arg0: i32, %arg1: i32, %arg2: i32) -> (i32, i32) {
    %c0_i32 = arith.constant 0 : i32
    %c0_i32_0 = arith.constant 0 : i32
    return %arg2, %c0_i32 : i32, i32
  }
  func.func @transform_3(%arg0: i32, %arg1: i32, %arg2: i32) -> (i32, i32, i32) {
    %c0_i32 = arith.constant 0 : i32
    return %arg0, %arg2, %arg1 : i32, i32, i32
  }
}

</mosaic_0001>

<bundles_post_ra>
// kernel: _lambda_.2
= control target key start
LH: loop header
LB: loop body
LE: loop exit
PB: predicated region body
PF: predicated region fallthrough
CT: control target
= control target key end

     0   :  { %s675_s15 = smov 0   ;;  %s677_s16 = smov 0   ;;  %s717_s0 = inlined_call_operand.vmem [shape: bf16[2,4,256], index: 0, kind: input, shape index: {}]   ;;  %s718_s1 = inlined_call_operand.vmem [shape: f32[8,1], index: 1, kind: input, shape index: {}]   ;;  %s719_s2 = inlined_call_operand.vmem [shape: f32[8,4], index: 2, kind: input, shape index: {}]   ;;  %s720_s3 = inlined_call_operand.vmem [shape: f32[8], index: 3, kind: input, shape index: {}]   ;;  %s721_s4 = inlined_call_operand.vmem [shape: f32[2,8,256], index: 4, kind: output, shape index: {}]  }
   0x1   :  { %s679_s17 = smov 0  }
   0x2 LB: > { %s33_s18 = sadd.s32 1, %s642_s16  ;;  %p585_p0 = scmp.ge.s32.totalorder %s646_s17, 1  ;;  %s646_s17 = sphi %s679_s17, %s14_s17   ;;  %s642_s16 = sphi %s677_s16, %s723_s16   ;;  %s638_s15 = sphi %s675_s15, %s722_s15  }
   0x3   : > { %p35_p1 = scmp.ge.s32.totalorder %s33_s18, 2  ;;  %p230_p2 = scmp.lt.s32.totalorder %s646_s17, 3 }
   0x5   : > { %s725_s18 = smov (%p35_p1, %s33_s18), 0  ;;  %p231_p3 = pnand %p585_p0, %p230_p2 }
   0x7   : > { %234 = sbr.rel (%p231_p3) target bundleno = 340 (0x154), region = 36 }
   0xc   : > { %v337_v0 = vld [vmem:[%s720_s3] ss:$0 sm:$0xff]  ;;  %p299_p4 = scmp.lt.s32.totalorder %s638_s15, 1  ;;  %v648_v1 = vmov 0   ;;  %vm376_vm0 = vcmask 1041408   ;;  %v649_v9 = vmov 0.0  }
   0xd   : > { %341 = vbcast.lane.b32.xlu0 %v337_v0, 256  ;;  %415 = vmatprep.mubr.bf16.mxu0 %v648_v1  ;;  %v357_v2 = vld [vmem:[%s718_s1] sm:$0xff]  ;;  %vm372_vm1 = vcmask 31744  }
   0xe   : > { %s727_s15 = smov (!%p299_p4, %s638_s15), 1  ;;  %623 = vset.pattern.permute.xlu0 %v648_v1  ;;  %v327_v6 = vld [vmem:[%s719_s2] sm:$0xff] }
   0xf   : > { %s595_s23 = sshll.u32 %s727_s15, 2  ;;  %s596_s29 = sshll.u32 %s727_s15, 4 }
  0x10   : > { %s306_s26 = scalar_lea.vmem %s717_s0, %s595_s23  ;;  %s324_s6 = scalar_lea.vmem %s721_s4, %s596_s29 }
  0x11   : > { %360 = vperm.xlu0 %623, %v357_v2   ;;  %v590_v3 = vld.sshfl [vmem:[%s306_s26] sm:$0x33 pattern:$0x76325410] }
  0x12   : > { %v371_v4 = vcombine.high %v590_v3, %v590_v3  ;;  %v378_v5 = vsel %vm376_vm0, %v590_v3, 0 }
  0x14   : > { %591 = vmatprep.subr.msk.bf16.mxu0 %vm376_vm0, %v371_v4 }
  0x15   : > { %398 = vmatpush1.bf16.msra.mxu0 %v378_v5 }
  0x7f   : > { %v342_v7 = vpop.permute.xlu0 %341 }
  0x80   : > { %v345_v8 = vmul.f32 %v342_v7, %v327_v6 }
  0x82   : > { %v350_v10 = vpack.c.bf16 %v649_v9, %v345_v8 }
  0x84   : > { %353 = vst [vmem:[#allocation2] sm:$0xf] %v350_v10 }
  0x8b   : > { %v355_v11 = vld [vmem:[#allocation2] sm:$0xf] }
  0x8c   : > { %592 = vmatmul.mubr.msk.bf16.vlgmr.msra.gmra.mxu0 %vm372_vm1, %v355_v11  ;;  %v361_v12 = vpop.permute.xlu0 %360 }
 0x14c   : > { %v417_v13 = vpop.f32.mrf.mxu0 }
 0x14d   : > { %v418_v14 = vadd.f32 %v417_v13, %v361_v12 }
 0x14e   : > { %v419_v15 = vpop.f32.mrf.mxu0 }
 0x14f   : > { %v424_v16 = vmax.f32 %v418_v14, 0.0  ;;  %v420_v17 = vadd.f32 %v419_v15, %v361_v12 }
 0x150   : > { %v421_v18 = vpop.f32.mrf.mxu0 }
 0x151   : > { %426 = vst [vmem:[%s324_s6] sm:$0xff] %v424_v16  ;;  %v425_v19 = vmax.f32 %v420_v17, 0.0 }
 0x152   : > { %v422_v20 = vpop.f32.mrf.mxu0 }
 0x153   : > { %427 = vst [vmem:[%s324_s6 + $0x8] sm:$0xff] %v425_v19 }
 0x154 PF: > { %s14_s17 = sadd.s32 1, %s646_s17   ;;  %s722_s15 = smov %s642_s16 }
 0x155   : > { %p11_p5 = scmp.ge.s32.totalorder %s14_s17, 4   ;;  %s723_s16 = smov %s725_s18 }
 0x157   :  { %13 = sbr.rel (!%p11_p5) target bundleno = 2 (0x2), region = 77 }

</bundles_post_ra>
